<compile_context>
chip_gen: v6e
topology: v6e:2x2x1
jax: 0.10.0
libtpu: 0.0.40
codegen_flags: <defaults>
</compile_context>

<pallas_src>
import functools

import jax
import jax.numpy as jnp
from jax.experimental import pallas as pl
from jax.experimental.pallas import tpu as pltpu


def _cross_attn_kernel(x_ref, g_ref, beta_ref, wkv_ref, wq_ref, wo_ref,
                       bo_ref, sel_ref, selt_ref, o_ref, *, heads, dim_head):
    bt, n, dim = x_ref.shape
    inner = heads * dim_head

    # ---- LayerNorm (pre_norm), eps = 1e-5, elementwise affine; f32 ----
    x = x_ref[...].reshape(bt * n, dim)
    mean = jnp.mean(x, axis=-1, keepdims=True)
    xc = x - mean
    var = jnp.mean(xc * xc, axis=-1, keepdims=True)
    xn = xc * jax.lax.rsqrt(var + 1e-5)
    xn = xn * g_ref[...] + beta_ref[...]                      # (bt*n, dim)
    xn_bf = xn.astype(jnp.bfloat16)

    # ---- Fused K/V projection: one MXU matmul (bf16 in, f32 accumulate) ----
    kv = jnp.dot(xn_bf, wkv_ref[...],
                 preferred_element_type=jnp.float32)          # (bt*n, 2*inner)
    k3 = kv[:, :inner].reshape(bt, n, inner)
    v3 = kv[:, inner:].reshape(bt, n, inner)

    # ---- Q projection from token 0 (static slice; scale pre-folded in Wq) ----
    q_in = xn_bf.reshape(bt, n, dim)[:, 0, :]                 # (bt, dim)
    q = jnp.dot(q_in, wq_ref[...],
                preferred_element_type=jnp.float32)           # (bt, inner)

    # ---- Scores: dots[b, j, h] = <q[b, head h], k[b, j, head h]> ----
    # Head-grouped reduce via the tiny constant selector on the MXU (bf16).
    prod = q[:, None, :] * k3                                 # (bt, n, inner) VPU f32
    dots = jnp.dot(prod.reshape(bt * n, inner).astype(jnp.bfloat16),
                   sel_ref[...],
                   preferred_element_type=jnp.float32).reshape(bt, n, heads)

    # ---- Softmax over the n keys (single query per batch element) ----
    dots = dots - jnp.max(dots, axis=1, keepdims=True)
    e = jnp.exp(dots)
    denom = jnp.sum(e, axis=1, keepdims=True)                 # (bt, 1, heads)
    attn = e * pl.reciprocal(denom, approx=True)              # (bt, n, heads)

    # ---- out[b, h*d+i] = sum_j attn[b, j, h] * v[b, j, h*d+i] ----
    attn_full = jnp.dot(attn.reshape(bt * n, heads).astype(jnp.bfloat16),
                        selt_ref[...],
                        preferred_element_type=jnp.float32).reshape(bt, n, inner)
    out = jnp.sum(attn_full * v3, axis=1)                     # (bt, inner)

    # ---- Output projection (to_out Linear; Dropout is identity in eval) ----
    y = jnp.dot(out.astype(jnp.bfloat16), wo_ref[...],
                preferred_element_type=jnp.float32) + bo_ref[...]
    o_ref[...] = y                                            # (bt, dim_pad) lane-dense slab


def _tpu_topology():
    """(num_tensorcores, is_v7x) — conservative fallbacks if not on TPU."""
    num_cores, is_v7x = 1, False
    try:
        d = jax.devices()[0]
        kind = (getattr(d, "device_kind", "") or "").lower()
        is_v7x = "v7" in kind
        if is_v7x:
            num_cores = 2
        else:
            num_cores = int(getattr(d, "num_cores", 1) or 1)
    except Exception:
        pass
    return num_cores, is_v7x


def _pick_b_tile(b, n, num_cores, target_rows):
    """Batch tile so a grid step feeds the MXU/DMA ~target_rows rows.  Only
    split the batch across grid steps when there is >1 TensorCore to shard
    onto (splitting on a single-TC chip just adds per-step overhead)."""
    bt = max(1, min(b, pl.cdiv(target_rows, n)))
    if num_cores > 1 and b > 1:
        bt = min(bt, max(1, pl.cdiv(b, num_cores)))
    return bt


def cross_attention(x, params, *, heads, dim_head, b_tile=None):
    """x: (b, n, dim) float32. Returns (b, 1, dim) float32."""
    b, n, dim = x.shape
    inner = heads * dim_head
    scale = dim_head ** -0.5

    num_cores, is_v7x = _tpu_topology()
    if b_tile is None:
        target_rows = 256 if is_v7x else 512
        b_tile = _pick_b_tile(b, n, num_cores, target_rows)
    grid_b = pl.cdiv(b, b_tile)
    b_pad = grid_b * b_tile
    if b_pad != b:
        x = jnp.pad(x, ((0, b_pad - b), (0, 0), (0, 0)))

    # Lane-dense output slab: pad the projection output dim to a 128 multiple.
    dim_pad = ((dim + 127) // 128) * 128

    # Host-side weight prep (f32 math, then bf16 cast halves weight DMA bytes;
    # matmuls still accumulate in f32).
    wkv = jnp.concatenate([params["wk"], params["wv"]], axis=1).astype(jnp.bfloat16)
    wq = (params["wq"] * scale).astype(jnp.bfloat16)          # scale folded once, on host
    wo = params["wo"].astype(jnp.float32)
    bo = params["bo"].astype(jnp.float32)
    if dim_pad != dim:
        wo = jnp.pad(wo, ((0, 0), (0, dim_pad - dim)))
        bo = jnp.pad(bo, ((0, 0), (0, dim_pad - dim)))
    wo = wo.astype(jnp.bfloat16)

    # Constant 0/1 head-selector matrices, built once on the host (bf16).
    hid = jnp.arange(inner, dtype=jnp.int32) // dim_head
    sel = (hid[:, None] == jnp.arange(heads, dtype=jnp.int32)[None, :]
           ).astype(jnp.bfloat16)                             # (inner, heads)
    sel_t = jnp.transpose(sel)                                # (heads, inner)

    kernel = functools.partial(_cross_attn_kernel, heads=heads, dim_head=dim_head)

    # Explicit VMEM budget (single-buffered constants + double-buffered x/out
    # + activation estimate), capped at v7x's 64 MiB physical VMEM.
    bytes_x = 2 * b_tile * n * dim * 4
    bytes_w = 2 * (dim * 2 * inner + dim * inner + inner * dim_pad
                   + 2 * inner * heads) + 4 * (2 * dim + dim_pad)
    bytes_out = 2 * b_tile * dim_pad * 4
    bytes_act = b_tile * n * (dim + 5 * inner) * 4 + b_tile * (2 * inner + dim_pad) * 4
    est = bytes_x + bytes_w + bytes_out + bytes_act
    vmem_limit = int(min(64 << 20, max(32 << 20, 4 * est)))

    # Advisory cost so XLA can overlap this small custom call with neighbors.
    flops = (2 * b_pad * n * dim * (2 * inner)        # fused K/V projection
             + 2 * b_pad * dim * inner                # Q projection
             + 2 * 2 * b_pad * n * inner * heads      # head-selector matmuls
             + 2 * b_pad * inner * dim_pad            # output projection
             + b_pad * n * (6 * dim + 4 * inner))     # LN + softmax elementwise
    transcendentals = b_pad * n * (heads + 1) + b_pad * heads
    bytes_accessed = (4 * b_pad * n * dim + 4 * b_pad * dim_pad
                      + 2 * (3 * dim * inner + inner * dim_pad) + 4 * 3 * dim)
    cost = pl.CostEstimate(flops=int(flops),
                           transcendentals=int(transcendentals),
                           bytes_accessed=int(bytes_accessed))

    def _const_spec(shape):
        nd = len(shape)
        # Constant blocks: fetched once -> single buffer halves resident VMEM.
        return pl.BlockSpec(shape, lambda i: (0,) * nd,
                            pipeline_mode=pl.Buffered(1))

    grid_spec = pltpu.PrefetchScalarGridSpec(
        num_scalar_prefetch=0,
        grid=(grid_b,),
        in_specs=[
            pl.BlockSpec((b_tile, n, dim), lambda i: (i, 0, 0)),   # x (batch-tiled)
            _const_spec((1, dim)),                                 # LN gamma
            _const_spec((1, dim)),                                 # LN beta
            _const_spec((dim, 2 * inner)),                         # [Wk|Wv]^T (bf16)
            _const_spec((dim, inner)),                             # Wq^T * scale (bf16)
            _const_spec((inner, dim_pad)),                         # Wo^T (bf16, lane-padded)
            _const_spec((1, dim_pad)),                             # bo (lane-padded)
            _const_spec((inner, heads)),                           # head selector
            _const_spec((heads, inner)),                           # head selector^T
        ],
        # Lane-dense (b_tile, dim_pad) output slab per step; the size-1 seq
        # dim and the dim padding are handled outside the kernel.
        out_specs=pl.BlockSpec((None, b_tile, dim_pad), lambda i: (i, 0, 0)),
    )

    out = pl.pallas_call(
        kernel,
        out_shape=jax.ShapeDtypeStruct((grid_b, b_tile, dim_pad), jnp.float32),
        grid_spec=grid_spec,
        compiler_params=pltpu.CompilerParams(
            dimension_semantics=("parallel",),
            vmem_limit_bytes=vmem_limit),
        cost_estimate=cost,
    )(x, params["gamma"], params["beta"], wkv, wq, wo, bo, sel, sel_t)

    return out.reshape(b_pad, dim_pad)[:b, :dim].reshape(b, 1, dim)


def cross_attention_ref(x, params, *, heads, dim_head):
    """Pure-JAX f32 reference mirroring the PyTorch forward."""
    b, n, dim = x.shape
    scale = dim_head ** -0.5
    mean = jnp.mean(x, axis=-1, keepdims=True)
    var = jnp.mean((x - mean) ** 2, axis=-1, keepdims=True)
    xn = (x - mean) / jnp.sqrt(var + 1e-5)
    xn = xn * params["gamma"][0] + params["beta"][0]
    k = xn @ params["wk"]                                # (b, n, inner)
    v = xn @ params["wv"]
    q = xn[:, 0:1, :] @ params["wq"]                     # (b, 1, inner)
    kh = k.reshape(b, n, heads, dim_head).transpose(0, 2, 1, 3)   # (b,h,n,d)
    vh = v.reshape(b, n, heads, dim_head).transpose(0, 2, 1, 3)
    qh = q.reshape(b, 1, heads, dim_head).transpose(0, 2, 1, 3)   # (b,h,1,d)
    dots = jnp.einsum("bhid,bhjd->bhij", qh, kh) * scale
    attn = jax.nn.softmax(dots, axis=-1)
    out = jnp.einsum("bhij,bhjd->bhid", attn, vh)                 # (b,h,1,d)
    out = out.transpose(0, 2, 1, 3).reshape(b, 1, heads * dim_head)
    return out @ params["wo"] + params["bo"][0]


if __name__ == "__main__":
    # Small shapes consistent with the module.
    B, N, DIM = 2, 8, 32
    HEADS, DIM_HEAD = 4, 16
    INNER = HEADS * DIM_HEAD

    key = jax.random.PRNGKey(0)
    ks = jax.random.split(key, 8)
    x = jax.random.normal(ks[0], (B, N, DIM), dtype=jnp.float32)

    # PyTorch Linear weights are (out, in); we store the transpose (in, out).
    params = {
        "gamma": jnp.ones((1, DIM), jnp.float32)
                 + 0.01 * jax.random.normal(ks[1], (1, DIM)),
        "beta":  0.01 * jax.random.normal(ks[2], (1, DIM)),
        "wk": 0.05 * jax.random.normal(ks[3], (DIM, INNER), dtype=jnp.float32),
        "wv": 0.05 * jax.random.normal(ks[4], (DIM, INNER), dtype=jnp.float32),
        "wq": 0.05 * jax.random.normal(ks[5], (DIM, INNER), dtype=jnp.float32),
        "wo": 0.05 * jax.random.normal(ks[6], (INNER, DIM), dtype=jnp.float32),
        "bo": 0.01 * jax.random.normal(ks[7], (1, DIM), dtype=jnp.float32),
    }

    out = cross_attention(x, params, heads=HEADS, dim_head=DIM_HEAD)
    out = jax.block_until_ready(out)

    ref = cross_attention_ref(x, params, heads=HEADS, dim_head=DIM_HEAD)
    assert out.shape == (B, 1, DIM), out.shape
    # bf16 MXU operands (f32 accumulation) + approx reciprocal -> compare
    # against the pure-f32 reference with a correspondingly looser tolerance.
    max_err = float(jnp.max(jnp.abs(out - ref)))
    assert jnp.allclose(out, ref, atol=2e-2, rtol=2e-2), max_err

    print("KERNEL_OK")
</pallas_src>

<mosaic_0001>
module attributes {stable_mosaic.version = 11 : i64} {
  func.func @_cross_attn_kernel(%arg0: i32, %arg1: memref<2x8x32xf32, #tpu.memory_space<vmem>>, %arg2: memref<1x32xf32, #tpu.memory_space<vmem>>, %arg3: memref<1x32xf32, #tpu.memory_space<vmem>>, %arg4: memref<32x128xbf16, #tpu.memory_space<vmem>>, %arg5: memref<32x64xbf16, #tpu.memory_space<vmem>>, %arg6: memref<64x128xbf16, #tpu.memory_space<vmem>>, %arg7: memref<1x128xf32, #tpu.memory_space<vmem>>, %arg8: memref<64x4xbf16, #tpu.memory_space<vmem>>, %arg9: memref<4x64xbf16, #tpu.memory_space<vmem>>, %arg10: memref<1x2x128xf32, #tpu.memory_space<vmem>>) attributes {dimension_semantics = [#tpu.dimension_semantics<parallel>], iteration_bounds = array<i64: 1>, scalar_prefetch = 0 : i64, scratch_operands = 0 : i64, tpu.core_type = #tpu.core_type<tc>, window_params = [{transform_indices = @transform_0, window_bounds = array<i64: 2, 8, 32>}, {pipeline_mode = #tpu.pipeline_mode<synchronous>, transform_indices = @transform_1, window_bounds = array<i64: 1, 32>}, {pipeline_mode = #tpu.pipeline_mode<synchronous>, transform_indices = @transform_2, window_bounds = array<i64: 1, 32>}, {pipeline_mode = #tpu.pipeline_mode<synchronous>, transform_indices = @transform_3, window_bounds = array<i64: 32, 128>}, {pipeline_mode = #tpu.pipeline_mode<synchronous>, transform_indices = @transform_4, window_bounds = array<i64: 32, 64>}, {pipeline_mode = #tpu.pipeline_mode<synchronous>, transform_indices = @transform_5, window_bounds = array<i64: 64, 128>}, {pipeline_mode = #tpu.pipeline_mode<synchronous>, transform_indices = @transform_6, window_bounds = array<i64: 1, 128>}, {pipeline_mode = #tpu.pipeline_mode<synchronous>, transform_indices = @transform_7, window_bounds = array<i64: 64, 4>}, {pipeline_mode = #tpu.pipeline_mode<synchronous>, transform_indices = @transform_8, window_bounds = array<i64: 4, 64>}, {transform_indices = @transform_9, window_bounds = array<i64: 1, 2, 128>}]} {
    %c0 = arith.constant 0 : index
    %c0_0 = arith.constant 0 : index
    %c0_1 = arith.constant 0 : index
    %0 = vector.load %arg1[%c0, %c0_0, %c0_1] : memref<2x8x32xf32, #tpu.memory_space<vmem>>, vector<2x8x32xf32>
    %1 = vector.shape_cast %0 : vector<2x8x32xf32> to vector<16x32xf32>
    %cst = arith.constant dense<0.000000e+00> : vector<16xf32>
    %2 = vector.multi_reduction <add>, %1, %cst [1] : vector<16x32xf32> to vector<16xf32>
    %3 = vector.shape_cast %2 : vector<16xf32> to vector<16x1xf32>
    %cst_2 = arith.constant 3.200000e+01 : f32
    %4 = vector.broadcast %cst_2 : f32 to vector<16x1xf32>
    %5 = arith.divf %3, %4 : vector<16x1xf32>
    %6 = vector.broadcast %5 : vector<16x1xf32> to vector<16x32xf32>
    %7 = arith.subf %1, %6 : vector<16x32xf32>
    %8 = arith.mulf %7, %7 : vector<16x32xf32>
    %cst_3 = arith.constant dense<0.000000e+00> : vector<16xf32>
    %9 = vector.multi_reduction <add>, %8, %cst_3 [1] : vector<16x32xf32> to vector<16xf32>
    %10 = vector.shape_cast %9 : vector<16xf32> to vector<16x1xf32>
    %cst_4 = arith.constant 3.200000e+01 : f32
    %11 = vector.broadcast %cst_4 : f32 to vector<16x1xf32>
    %12 = arith.divf %10, %11 : vector<16x1xf32>
    %cst_5 = arith.constant 9.99999974E-6 : f32
    %13 = vector.broadcast %cst_5 : f32 to vector<16x1xf32>
    %14 = arith.addf %12, %13 : vector<16x1xf32>
    %15 = math.rsqrt %14 : vector<16x1xf32>
    %16 = vector.broadcast %15 : vector<16x1xf32> to vector<16x32xf32>
    %17 = arith.mulf %7, %16 : vector<16x32xf32>
    %c0_6 = arith.constant 0 : index
    %c0_7 = arith.constant 0 : index
    %18 = vector.load %arg2[%c0_6, %c0_7] : memref<1x32xf32, #tpu.memory_space<vmem>>, vector<1x32xf32>
    %19 = vector.broadcast %18 : vector<1x32xf32> to vector<16x32xf32>
    %20 = arith.mulf %17, %19 : vector<16x32xf32>
    %c0_8 = arith.constant 0 : index
    %c0_9 = arith.constant 0 : index
    %21 = vector.load %arg3[%c0_8, %c0_9] : memref<1x32xf32, #tpu.memory_space<vmem>>, vector<1x32xf32>
    %22 = vector.broadcast %21 : vector<1x32xf32> to vector<16x32xf32>
    %23 = arith.addf %20, %22 : vector<16x32xf32>
    %24 = arith.truncf %23 : vector<16x32xf32> to vector<16x32xbf16>
    %c0_10 = arith.constant 0 : index
    %c0_11 = arith.constant 0 : index
    %25 = vector.load %arg4[%c0_10, %c0_11] : memref<32x128xbf16, #tpu.memory_space<vmem>>, vector<32x128xbf16>
    %cst_12 = arith.constant dense<0.000000e+00> : vector<16x128xf32>
    %26 = tpu.matmul %24, %25, %cst_12 {dimension_numbers = #tpu.dot_dimension_numbers<[1], [0], [0], [1], [0, 0, 1, 1], [], []>} : vector<16x32xbf16>, vector<32x128xbf16>, vector<16x128xf32> -> vector<16x128xf32>
    %27 = vector.extract_strided_slice %26 {offsets = [0, 0], sizes = [16, 64], strides = [1, 1]} : vector<16x128xf32> to vector<16x64xf32>
    %28 = vector.shape_cast %27 : vector<16x64xf32> to vector<2x8x64xf32>
    %29 = vector.extract_strided_slice %26 {offsets = [0, 64], sizes = [16, 64], strides = [1, 1]} : vector<16x128xf32> to vector<16x64xf32>
    %30 = vector.shape_cast %29 : vector<16x64xf32> to vector<2x8x64xf32>
    %31 = vector.shape_cast %24 : vector<16x32xbf16> to vector<2x8x32xbf16>
    %32 = vector.extract_strided_slice %31 {offsets = [0, 0, 0], sizes = [2, 1, 32], strides = [1, 1, 1]} : vector<2x8x32xbf16> to vector<2x1x32xbf16>
    %33 = vector.shape_cast %32 : vector<2x1x32xbf16> to vector<2x32xbf16>
    %c0_13 = arith.constant 0 : index
    %c0_14 = arith.constant 0 : index
    %34 = vector.load %arg5[%c0_13, %c0_14] : memref<32x64xbf16, #tpu.memory_space<vmem>>, vector<32x64xbf16>
    %cst_15 = arith.constant dense<0.000000e+00> : vector<2x64xf32>
    %35 = tpu.matmul %33, %34, %cst_15 {dimension_numbers = #tpu.dot_dimension_numbers<[1], [0], [0], [1], [0, 0, 1, 1], [], []>} : vector<2x32xbf16>, vector<32x64xbf16>, vector<2x64xf32> -> vector<2x64xf32>
    %36 = vector.shape_cast %35 : vector<2x64xf32> to vector<2x1x64xf32>
    %37 = vector.broadcast %36 : vector<2x1x64xf32> to vector<2x8x64xf32>
    %38 = arith.mulf %37, %28 : vector<2x8x64xf32>
    %39 = vector.shape_cast %38 : vector<2x8x64xf32> to vector<16x64xf32>
    %40 = arith.truncf %39 : vector<16x64xf32> to vector<16x64xbf16>
    %c0_16 = arith.constant 0 : index
    %c0_17 = arith.constant 0 : index
    %41 = vector.load %arg8[%c0_16, %c0_17] : memref<64x4xbf16, #tpu.memory_space<vmem>>, vector<64x4xbf16>
    %cst_18 = arith.constant dense<0.000000e+00> : vector<16x4xf32>
    %42 = tpu.matmul %40, %41, %cst_18 {dimension_numbers = #tpu.dot_dimension_numbers<[1], [0], [0], [1], [0, 0, 1, 1], [], []>} : vector<16x64xbf16>, vector<64x4xbf16>, vector<16x4xf32> -> vector<16x4xf32>
    %43 = vector.shape_cast %42 : vector<16x4xf32> to vector<2x8x4xf32>
    %cst_19 = arith.constant dense<0xFF800000> : vector<2x4xf32>
    %44 = vector.multi_reduction <maximumf>, %43, %cst_19 [1] : vector<2x8x4xf32> to vector<2x4xf32>
    %45 = vector.shape_cast %44 : vector<2x4xf32> to vector<2x1x4xf32>
    %46 = vector.broadcast %45 : vector<2x1x4xf32> to vector<2x8x4xf32>
    %47 = arith.subf %43, %46 : vector<2x8x4xf32>
    %48 = math.exp %47 : vector<2x8x4xf32>
    %cst_20 = arith.constant dense<0.000000e+00> : vector<2x4xf32>
    %49 = vector.multi_reduction <add>, %48, %cst_20 [1] : vector<2x8x4xf32> to vector<2x4xf32>
    %50 = vector.shape_cast %49 : vector<2x4xf32> to vector<2x1x4xf32>
    %51 = tpu.reciprocal %50 {approx = true} : vector<2x1x4xf32> -> vector<2x1x4xf32>
    %52 = vector.broadcast %51 : vector<2x1x4xf32> to vector<2x8x4xf32>
    %53 = arith.mulf %48, %52 : vector<2x8x4xf32>
    %54 = vector.shape_cast %53 : vector<2x8x4xf32> to vector<16x4xf32>
    %55 = arith.truncf %54 : vector<16x4xf32> to vector<16x4xbf16>
    %c0_21 = arith.constant 0 : index
    %c0_22 = arith.constant 0 : index
    %56 = vector.load %arg9[%c0_21, %c0_22] : memref<4x64xbf16, #tpu.memory_space<vmem>>, vector<4x64xbf16>
    %cst_23 = arith.constant dense<0.000000e+00> : vector<16x64xf32>
    %57 = tpu.matmul %55, %56, %cst_23 {dimension_numbers = #tpu.dot_dimension_numbers<[1], [0], [0], [1], [0, 0, 1, 1], [], []>} : vector<16x4xbf16>, vector<4x64xbf16>, vector<16x64xf32> -> vector<16x64xf32>
    %58 = vector.shape_cast %57 : vector<16x64xf32> to vector<2x8x64xf32>
    %59 = arith.mulf %58, %30 : vector<2x8x64xf32>
    %cst_24 = arith.constant dense<0.000000e+00> : vector<2x64xf32>
    %60 = vector.multi_reduction <add>, %59, %cst_24 [1] : vector<2x8x64xf32> to vector<2x64xf32>
    %61 = arith.truncf %60 : vector<2x64xf32> to vector<2x64xbf16>
    %c0_25 = arith.constant 0 : index
    %c0_26 = arith.constant 0 : index
    %62 = vector.load %arg6[%c0_25, %c0_26] : memref<64x128xbf16, #tpu.memory_space<vmem>>, vector<64x128xbf16>
    %cst_27 = arith.constant dense<0.000000e+00> : vector<2x128xf32>
    %63 = tpu.matmul %61, %62, %cst_27 {dimension_numbers = #tpu.dot_dimension_numbers<[1], [0], [0], [1], [0, 0, 1, 1], [], []>} : vector<2x64xbf16>, vector<64x128xbf16>, vector<2x128xf32> -> vector<2x128xf32>
    %c0_28 = arith.constant 0 : index
    %c0_29 = arith.constant 0 : index
    %64 = vector.load %arg7[%c0_28, %c0_29] : memref<1x128xf32, #tpu.memory_space<vmem>>, vector<1x128xf32>
    %65 = vector.broadcast %64 : vector<1x128xf32> to vector<2x128xf32>
    %66 = arith.addf %63, %65 : vector<2x128xf32>
    %c0_30 = arith.constant 0 : index
    %c0_31 = arith.constant 0 : index
    %c0_32 = arith.constant 0 : index
    %67 = vector.load %arg10[%c0_30, %c0_31, %c0_32] : memref<1x2x128xf32, #tpu.memory_space<vmem>>, vector<1x2x128xf32>
    %68 = vector.shape_cast %67 : vector<1x2x128xf32> to vector<2x128xf32>
    %69 = vector.shape_cast %66 : vector<2x128xf32> to vector<1x2x128xf32>
    tpu.vector_store %arg10[%c0_30, %c0_31, %c0_32], %69 {strides = array<i32>} : memref<1x2x128xf32, #tpu.memory_space<vmem>>, vector<1x2x128xf32>,
    return
  }
  func.func @transform_0(%arg0: i32) -> (i32, i32, i32) {
    %c0_i32 = arith.constant 0 : i32
    %c0_i32_0 = arith.constant 0 : i32
    %c0_i32_1 = arith.constant 0 : i32
    return %arg0, %c0_i32, %c0_i32_0 : i32, i32, i32
  }
  func.func @transform_1(%arg0: i32) -> (i32, i32) {
    %c0_i32 = arith.constant 0 : i32
    %c0_i32_0 = arith.constant 0 : i32
    %c0_i32_1 = arith.constant 0 : i32
    return %c0_i32, %c0_i32_0 : i32, i32
  }
  func.func @transform_2(%arg0: i32) -> (i32, i32) {
    %c0_i32 = arith.constant 0 : i32
    %c0_i32_0 = arith.constant 0 : i32
    %c0_i32_1 = arith.constant 0 : i32
    return %c0_i32, %c0_i32_0 : i32, i32
  }
  func.func @transform_3(%arg0: i32) -> (i32, i32) {
    %c0_i32 = arith.constant 0 : i32
    %c0_i32_0 = arith.constant 0 : i32
    %c0_i32_1 = arith.constant 0 : i32
    return %c0_i32, %c0_i32_0 : i32, i32
  }
  func.func @transform_4(%arg0: i32) -> (i32, i32) {
    %c0_i32 = arith.constant 0 : i32
    %c0_i32_0 = arith.constant 0 : i32
    %c0_i32_1 = arith.constant 0 : i32
    return %c0_i32, %c0_i32_0 : i32, i32
  }
  func.func @transform_5(%arg0: i32) -> (i32, i32) {
    %c0_i32 = arith.constant 0 : i32
    %c0_i32_0 = arith.constant 0 : i32
    %c0_i32_1 = arith.constant 0 : i32
    return %c0_i32, %c0_i32_0 : i32, i32
  }
  func.func @transform_6(%arg0: i32) -> (i32, i32) {
    %c0_i32 = arith.constant 0 : i32
    %c0_i32_0 = arith.constant 0 : i32
    %c0_i32_1 = arith.constant 0 : i32
    return %c0_i32, %c0_i32_0 : i32, i32
  }
  func.func @transform_7(%arg0: i32) -> (i32, i32) {
    %c0_i32 = arith.constant 0 : i32
    %c0_i32_0 = arith.constant 0 : i32
    %c0_i32_1 = arith.constant 0 : i32
    return %c0_i32, %c0_i32_0 : i32, i32
  }
  func.func @transform_8(%arg0: i32) -> (i32, i32) {
    %c0_i32 = arith.constant 0 : i32
    %c0_i32_0 = arith.constant 0 : i32
    %c0_i32_1 = arith.constant 0 : i32
    return %c0_i32, %c0_i32_0 : i32, i32
  }
  func.func @transform_9(%arg0: i32) -> (i32, i32, i32) {
    %c0_i32 = arith.constant 0 : i32
    %c0_i32_0 = arith.constant 0 : i32
    %c0_i32_1 = arith.constant 0 : i32
    return %arg0, %c0_i32, %c0_i32_0 : i32, i32, i32
  }
}

</mosaic_0001>

<bundles_post_ra>
// kernel: tpu_custom_call.1
= control target key start
LH: loop header
LB: loop body
LE: loop exit
PB: predicated region body
PF: predicated region fallthrough
CT: control target
= control target key end

     0   :  { %14 = vsyncpa [#allocation3], 0  ;;  %s951_s0 = inlined_call_operand.hbm [shape: f32[2,8,32], index: 0, kind: input, shape index: {}]   ;;  %s952_s1 = inlined_call_operand.vmem [shape: f32[1,32], index: 1, kind: input, shape index: {}]   ;;  %s953_s2 = inlined_call_operand.vmem [shape: f32[1,32], index: 2, kind: input, shape index: {}]   ;;  %s954_s3 = inlined_call_operand.hbm [shape: bf16[32,128], index: 3, kind: input, shape index: {}]   ;;  %s955_s4 = inlined_call_operand.hbm [shape: bf16[32,64], index: 4, kind: input, shape index: {}]   ;;  %s956_s5 = inlined_call_operand.vmem [shape: bf16[64,128], index: 5, kind: input, shape index: {}]   ;;  %s957_s6 = inlined_call_operand.vmem [shape: f32[1,128], index: 6, kind: input, shape index: {}]   ;;  %s958_s7 = inlined_call_operand.vmem [shape: bf16[64,4], index: 7, kind: input, shape index: {}]   ;;  %s959_s8 = inlined_call_operand.vmem [shape: bf16[4,64], index: 8, kind: input, shape index: {}]   ;;  %s960_s9 = inlined_call_operand.hbm [shape: f32[1,2,128], index: 9, kind: output, shape index: {}]  }
   0x1   :  { %15 = vsyncpa [#allocation6], 0 }
   0x2   :  { %16 = vsyncpa [#allocation4], 0  ;;  %s796_s30 = smov [#allocation5]  }
   0x3   :  { %s38_s10 = sshll.u32 %s796_s30, 4  ;;  %s39_s10 = int_to_ptr.vmem [resolvable:$true] %s38_s10 }
   0x4   :  { %s718_s11 = scalar_lea.vmem %s39_s10, 256  ;;  %p723_p1 = scmp.lt.s32.totalorder %s39_s10, %s39_s10 }
   0x5   :  { %p719_p0 = scmp.ne.s32.totalorder %s39_s10, %s718_s11  ;;  %p724_p2 = scmp.lt.s32.totalorder %s718_s11, %s718_s11 }
   0x7   :  { %p725_p3 = por %p724_p2, %p723_p1 }
   0x9   :  { %p726_p4 = pnand %p725_p3, %p719_p0 }
   0xb   :  { %729 = shalt.err (!%p726_p4)
}
   0xc   :  { %s797_s12 = smov 64   ;;  %s798_s13 = smov 4  }
   0xd   :  { %44 = dma.hbm_to_vmem [thread:$0]  %s954_s3, 256, %s39_s10, [#allocation6], %s797_s12, %s797_s12, %s798_s13  }
   0xe   :  { %s799_s16 = smov [#allocation2]  }
   0xf   :  { %s22_s17 = sshll.u32 %s799_s16, 4  ;;  %s23_s17 = int_to_ptr.vmem [resolvable:$true] %s22_s17 }
  0x10   :  { %s738_s18 = scalar_lea.vmem %s23_s17, 256  ;;  %p743_p6 = scmp.lt.s32.totalorder %s23_s17, %s23_s17 }
  0x11   :  { %p739_p5 = scmp.ne.s32.totalorder %s23_s17, %s738_s18  ;;  %p744_p7 = scmp.lt.s32.totalorder %s738_s18, %s738_s18 }
  0x13   :  { %p745_p8 = por %p744_p7, %p743_p6 }
  0x15   :  { %p746_p9 = pnand %p745_p8, %p739_p5 }
  0x17   :  { %749 = shalt.err (!%p746_p9)
}
  0x18   :  { %s800_s19 = smov 128   ;;  %s801_s20 = smov 8  }
  0x19   :  { %28 = dma.hbm_to_vmem [thread:$0]  %s951_s0, 256, %s23_s17, [#allocation3], %s800_s19, %s800_s19, %s801_s20  }
  0x1a   :  { %s802_s23 = smov [#allocation7]  }
  0x1b   :  { %s50_s24 = sshll.u32 %s802_s23, 4  ;;  %s51_s24 = int_to_ptr.vmem [resolvable:$true] %s50_s24 }
  0x1c   :  { %s758_s3 = scalar_lea.vmem %s51_s24, 256  ;;  %p763_p11 = scmp.lt.s32.totalorder %s51_s24, %s51_s24 }
  0x1d   :  { %p759_p10 = scmp.ne.s32.totalorder %s51_s24, %s758_s3  ;;  %p764_p12 = scmp.lt.s32.totalorder %s758_s3, %s758_s3 }
  0x1f   :  { %p765_p13 = por %p764_p12, %p763_p11 }
  0x21   :  { %p766_p0 = pnand %p765_p13, %p759_p10 }
  0x23   :  { %769 = shalt.err (!%p766_p0)
}
  0x24   :  { %56 = dma.hbm_to_vmem [thread:$0]  %s955_s4, 256, %s51_s24, [#allocation6], %s797_s12, %s797_s12, %s798_s13  }
  0x25   :  { %790 = dma.done.wait [#allocation3], 256  }
  0x26   :  { %791 = vsyncadd [#allocation3], 4294967040 }
  0x27   :  { %792 = dma.done.wait [#allocation6], 512  }
  0x28   :  { %793 = vsyncadd [#allocation6], 4294966784  ;;  %vm77_vm0 = vcmask 261120   ;;  %v76_v0 = vld [vmem:[#allocation2 + $0x8] sm:$0xff]  ;;  %v75_v1 = vld [vmem:[#allocation2] sm:$0xff]  ;;  %v803_v16 = vmov 0.0   ;;  %v258_v49 = vlaneseq }
  0x29   :  { %v81_v2 = vsel %vm77_vm0, %v76_v0, 0.0  ;;  %v78_v3 = vsel %vm77_vm0, %v75_v1, 0.0  ;;  %v686_v14 = vld [vmem:[#allocation5 + $0x8] sm:$0xff]   ;;  %v688_v15 = vld [vmem:[#allocation7 + $0x8] sm:$0xff]   ;;  %629 = vmatprep.subr.bf16.mxu0 %v803_v16  ;;  %637 = vmatprep.subr.bf16.mxu1 %v803_v16  ;;  %v687_v17 = vld [vmem:[#allocation5] sm:$0xff]   ;;  %vm804_vm1 = vmmov 0  }
  0x2a   :  { %82 = vadd.xlane.f32.xlu0 %v81_v2  ;;  %630 = vmatpush3.bf16.msra.mxu0 %v686_v14  ;;  %v689_v18 = vld [vmem:[#allocation7] sm:$0xff]   ;;  %vm196_vm2 = vcmask 1041409   ;;  %v690_v43 = vld [vmem:[%s958_s7 + $0x18] sm:$0xff]   ;;  %v691_v44 = vld [vmem:[%s958_s7 + $0x10] sm:$0xff]   ;;  %v805_v47 = vmov 1966171168  }
  0x2b   :  { %638 = vmatpush3.bf16.msra.mxu1 %v688_v15  ;;  %631 = vmatprep.subr.bf16.mxu0 %v803_v16  ;;  %v587_v26 = vld [vmem:[%s952_s1] ss:$0 sm:$0xff]  ;;  %v692_v45 = vld [vmem:[%s958_s7 + $0x8] sm:$0xff]   ;;  %v256_v48 = vunpack.c.l.s4 %v805_v47  ;;  %v259_v51 = vshrl.u32 %v258_v49, 7  ;;  %vm322_vm3 = vcmask 523264   ;;  %vm411_vm4 = vcmask 1041408  }
  0x2c   :  { %633 = vmatprep.mubr.msk.bf16.mxu0 %vm804_vm1, %v803_v16  ;;  %639 = vmatprep.subr.bf16.mxu1 %v803_v16  ;;  %v588_v28 = vld [vmem:[%s953_s2] ss:$0 sm:$0xff]  ;;  %vm367_vm5 = vcmask 31744   ;;  %s806_s23 = smov [#allocation8]  }
  0x2d   :  { %641 = vmatprep.mubr.msk.bf16.mxu1 %vm804_vm1, %v803_v16  ;;  %v693_v46 = vld [vmem:[%s958_s7] sm:$0xff]   ;;  %v257_v50 = vunpack.c.0.s8 %v256_v48  ;;  %v279_v58 = vsub.s32 0, %v259_v51  ;;  %s577_s24 = sshll.u32 %s806_s23, 4  ;;  %s578_s24 = int_to_ptr.vmem [resolvable:$true] %s577_s24 }
  0x2e   :  { %79 = vadd.xlane.f32.xlu0 %v78_v3  ;;  %632 = vmatpush3.bf16.msra.mxu0 %v687_v17  ;;  %s770_s3 = scalar_lea.vmem %s578_s24, 32  ;;  %p775_p2 = scmp.lt.s32.totalorder %s578_s24, %s578_s24 }
  0x2f   :  { %645 = vmatprep.subr.bf16.mxu0 %v803_v16  ;;  %640 = vmatpush3.bf16.msra.mxu1 %v689_v18  ;;  %v260_v54 = vsub.s32 %v257_v50, %v259_v51  ;;  %p771_p1 = scmp.ne.s32.totalorder %s578_s24, %s770_s3  ;;  %p776_p3 = scmp.lt.s32.totalorder %s770_s3, %s770_s3 }
  0x30   :  { %657 = vmatprep.subr.bf16.mxu1 %v803_v16 }
  0x31   :  { %p777_p4 = por %p776_p3, %p775_p2 }
  0x33   :  { %p778_p5 = pnand %p777_p4, %p771_p1 }
  0xb3   :  { %v83_v4 = vpop.xlane.xlu0 %82 }
  0xb4   :  { %v86_v5 = vmul.f32 0.03125, %v83_v4 }
  0xb6   :  { %v88_v6 = vsub.f32 %v76_v0, %v86_v5 }
  0xb7   :  { %v80_v7 = vpop.xlane.xlu0 %79 }
  0xb8   :  { %v85_v8 = vmul.f32 0.03125, %v80_v7  ;;  %v90_v9 = vmul.f32 %v88_v6, %v88_v6  ;;  %v407_v7 = vld [vmem:[%s959_s8] sm:$0x3] }
  0xba   :  { %v87_v10 = vsub.f32 %v75_v1, %v85_v8  ;;  %v94_v11 = vsel %vm77_vm0, %v90_v9, 0.0  ;;  %v413_v8 = vsel %vm411_vm4, %v407_v7, 0 }
  0xbb   :  { %95 = vadd.xlane.f32.xlu1 %v94_v11 }
  0xbc   :  { %v89_v12 = vmul.f32 %v87_v10, %v87_v10 }
  0xbe   :  { %v91_v13 = vsel %vm77_vm0, %v89_v12, 0.0 }
  0xbf   :  { %92 = vadd.xlane.f32.xlu1 %v91_v13 }
 0x144   :  { %v96_v19 = vpop.xlane.xlu1 %95 }
 0x145   :  { %v98_v20 = vmul.f32 0.03125, %v96_v19 }
 0x147   :  { %v100_v21 = vadd.f32 1e-05, %v98_v20 }
 0x148   :  { %v93_v22 = vpop.xlane.xlu1 %92 }
 0x149   :  { %698 = vrsqrt.f32 %v100_v21  ;;  %v97_v23 = vmul.f32 0.03125, %v93_v22 }
 0x14b   :  { %v99_v24 = vadd.f32 1e-05, %v97_v23 }
 0x14d   :  { %700 = vrsqrt.f32 %v99_v24 }
 0x156   :  { %v699_v25 = vpop.eup %698 }
 0x157   :  { %v104_v27 = vmul.f32 %v699_v25, %v88_v6 }
 0x159   :  { %v113_v29 = vmul.f32 %v587_v26, %v104_v27 }
 0x15a   :  { %v701_v30 = vpop.eup %700 }
 0x15b   :  { %v103_v31 = vmul.f32 %v701_v30, %v87_v10  ;;  %v122_v32 = vadd.f32 %v588_v28, %v113_v29 }
 0x15d   :  { %v112_v33 = vmul.f32 %v587_v26, %v103_v31  ;;  %v610_v34 = vpack.c.bf16 %v122_v32, %v122_v32 }
 0x15f   :  { %v121_v35 = vadd.f32 %v588_v28, %v112_v33  ;;  %v194_v36 = vunpack.c.l.b16 %v610_v34 }
 0x161   :  { %v123_v37 = vpack.c.bf16 %v122_v32, %v121_v35  ;;  %v609_v38 = vpack.c.bf16 %v121_v35, %v121_v35  ;;  %v195_v40 = vrot.slane %v194_v36, 7 }
 0x163   :  { %634 = vmatmul.mubr.msk.bf16.vlgmr.msra.gmra.mxu0 %vm77_vm0, %v123_v37  ;;  %v193_v39 = vunpack.c.l.b16 %v609_v38 }
 0x164   :  { %653 = vmatprep.mubr.msk.bf16.mxu0 %vm804_vm1, %v803_v16  ;;  %646 = vmatpush3.bf16.msra.mxu0 %v690_v43 }
 0x165   :  { %v197_v41 = vsel %vm196_vm2, %v195_v40, %v193_v39  ;;  %647 = vmatprep.subr.bf16.mxu0 %v803_v16 }
 0x166   :  { %v198_v42 = vpack.c.b16 %v197_v41, %v197_v41 }
 0x168   :  { %642 = vmatmul.mubr.msk.bf16.vlgmr.msra.gmra.mxu1 %vm77_vm0, %v198_v42  ;;  %648 = vmatpush3.bf16.msra.mxu0 %v691_v44 }
 0x169   :  { %659 = vmatprep.mubr.msk.bf16.mxu1 %vm804_vm1, %v803_v16  ;;  %649 = vmatprep.subr.bf16.mxu0 %v803_v16 }
 0x16a   :  { %658 = vmatpush3.bf16.msra.mxu1 %v413_v8 }
 0x16b   :  { %663 = vmatprep.subr.bf16.mxu1 %v803_v16 }
 0x16c   :  { %650 = vmatpush3.bf16.msra.mxu0 %v692_v45 }
 0x16d   :  { %651 = vmatprep.subr.bf16.mxu0 %v803_v16 }
 0x170   :  { %652 = vmatpush3.bf16.msra.mxu0 %v693_v46 }
 0x223   :  { %v177_v52 = vpop.f32.mrf.mxu0 }
 0x224   :  { %458 = vrot.lane.b32.xlu0 %v177_v52, %s797_s12 }
 0x225   :  { %v635_v53 = vpop.f32.mrf.mxu0 }
 0x226   :  { %v694_v53 = vld [vmem:[%s956_s5 + $0x18] sm:$0xff]  }
 0x227   :  { %v180_v55 = vpop.f32.mrf.mxu0 }
 0x228   :  { %v248_v56 = vpop.f32.mrf.mxu1  ;;  %460 = vrot.lane.b32.xlu1 %v180_v55, %s797_s12 }
 0x229   :  { %v261_v57 = vrot.slane %v248_v56, %v260_v54  ;;  %v636_v59 = vpop.f32.mrf.mxu0  ;;  %v697_v56 = vld [vmem:[%s956_s5] sm:$0xff]  }
 0x22a   :  { %v643_v60 = vpop.f32.mrf.mxu1 }
 0x22b   :  { %v262_v61 = vcombine.high %v261_v57, %v261_v57  ;;  %v269_v62 = vrot.slane %v261_v57, %v260_v54 }
 0x22c   :  { %v251_v63 = vpop.f32.mrf.mxu1 }
 0x22d   :  { %v276_v0 = vrot.slane %v262_v61, %v260_v54  ;;  %v280_v1 = vrot.slane %v269_v62, %v279_v58  ;;  %v695_v54 = vld [vmem:[%s956_s5 + $0x10] sm:$0xff]  }
 0x22e   :  { %v644_v2 = vpop.f32.mrf.mxu1 }
 0x22f   :  { %v284_v3 = vrot.slane %v276_v0, %v279_v58  ;;  %v287_v4 = vmul.f32 %v280_v1, %v177_v52 }
 0x231   :  { %v288_v5 = vmul.f32 %v284_v3, %v180_v55  ;;  %v696_v55 = vld [vmem:[%s956_s5 + $0x8] sm:$0xff]  }
 0x233   :  { %v289_v6 = vpack.c.bf16 %v288_v5, %v287_v4 }
 0x235   :  { %654 = vmatmul.mubr.msk.bf16.vlgmr.msra.gmra.mxu0 %vm322_vm3, %v289_v6 }
 0x296   :  { %v459_v57 = vpop.permute.xlu0 %458 }
 0x29a   :  { %v461_v62 = vpop.permute.xlu1 %460 }
 0x2f5   :  { %v360_v9 = vpop.f32.mrf.mxu0 }
 0x2f6   :  { %v368_v10 = vsel %vm367_vm5, %v360_v9, -inf }
 0x2f7   :  { %v369_v11 = vrot.slane %v368_v10, 4  ;;  %v655_v12 = vpop.f32.mrf.mxu0 }
 0x2f9   :  { %v370_v13 = vmax.f32 %v368_v10, %v369_v11  ;;  %v363_v14 = vpop.f32.mrf.mxu0 }
 0x2fa   :  { %v375_v15 = vsel %vm367_vm5, %v363_v14, -inf }
 0x2fb   :  { %v371_v17 = vrot.slane %v370_v13, 2  ;;  %v376_v18 = vrot.slane %v375_v15, 4  ;;  %v656_v19 = vpop.f32.mrf.mxu0 }
 0x2fd   :  { %v372_v20 = vmax.f32 %v370_v13, %v371_v17  ;;  %v377_v21 = vmax.f32 %v375_v15, %v376_v18 }
 0x2ff   :  { %v373_v22 = vrot.slane %v372_v20, 1  ;;  %v378_v23 = vrot.slane %v377_v21, 2 }
 0x301   :  { %v374_v24 = vmax.f32 %v372_v20, %v373_v22  ;;  %v379_v25 = vmax.f32 %v377_v21, %v378_v23  ;;  %v603_v21 = vld [vmem:[%s957_s6] ss:$0 sm:$0xff] }
 0x303   :  { %v382_v26 = vsub.f32 %v360_v9, %v374_v24  ;;  %v380_v27 = vrot.slane %v379_v25, 1 }
 0x305   :  { %v384_v28 = vmul.f32 1.442695, %v382_v26  ;;  %v381_v29 = vmax.f32 %v379_v25, %v380_v27 }
 0x307   :  { %702 = vpow2.f32 %v384_v28  ;;  %v383_v30 = vsub.f32 %v363_v14, %v381_v29 }
 0x309   :  { %v386_v31 = vmul.f32 1.442695, %v383_v30 }
 0x30b   :  { %704 = vpow2.f32 %v386_v31 }
 0x314   :  { %v703_v32 = vpop.eup %702 }
 0x315   :  { %v388_v33 = vsel %vm367_vm5, %v703_v32, 0.0 }
 0x316   :  { %v389_v34 = vrot.slane %v388_v33, 4 }
 0x318   :  { %v705_v35 = vpop.eup %704  ;;  %v390_v36 = vadd.f32 %v389_v34, %v388_v33 }
 0x319   :  { %v395_v37 = vsel %vm367_vm5, %v705_v35, 0.0 }
 0x31a   :  { %v391_v38 = vrot.slane %v390_v36, 2  ;;  %v396_v39 = vrot.slane %v395_v37, 4 }
 0x31c   :  { %v392_v40 = vadd.f32 %v391_v38, %v390_v36  ;;  %v397_v41 = vadd.f32 %v396_v39, %v395_v37 }
 0x31e   :  { %v393_v42 = vrot.slane %v392_v40, 1  ;;  %v398_v43 = vrot.slane %v397_v41, 2 }
 0x320   :  { %v394_v44 = vadd.f32 %v393_v42, %v392_v40  ;;  %v399_v45 = vadd.f32 %v398_v43, %v397_v41 }
 0x322   :  { %v400_v46 = vrot.slane %v399_v45, 1  ;;  %706 = vrcp.f32 %v394_v44 }
 0x324   :  { %v401_v47 = vadd.f32 %v400_v46, %v399_v45 }
 0x326   :  { %708 = vrcp.f32 %v401_v47 }
 0x32f   :  { %v707_v48 = vpop.eup %706 }
 0x330   :  { %v404_v50 = vmul.f32 %v707_v48, %v703_v32 }
 0x333   :  { %v709_v49 = vpop.eup %708 }
 0x334   :  { %v405_v51 = vmul.f32 %v709_v49, %v705_v35 }
 0x336   :  { %v406_v52 = vpack.c.bf16 %v405_v51, %v404_v50 }
 0x338   :  { %660 = vmatmul.mubr.msk.bf16.vlgmr.msra.gmra.mxu1 %vm367_vm5, %v406_v52 }
 0x339   :  { %671 = vmatprep.mubr.msk.bf16.mxu1 %vm804_vm1, %v803_v16  ;;  %664 = vmatpush3.bf16.msra.mxu1 %v694_v53 }
 0x33a   :  { %665 = vmatprep.subr.bf16.mxu1 %v803_v16 }
 0x33d   :  { %666 = vmatpush3.bf16.msra.mxu1 %v695_v54 }
 0x33e   :  { %667 = vmatprep.subr.bf16.mxu1 %v803_v16 }
 0x341   :  { %668 = vmatpush3.bf16.msra.mxu1 %v696_v55 }
 0x342   :  { %669 = vmatprep.subr.bf16.mxu1 %v803_v16 }
 0x345   :  { %670 = vmatpush3.bf16.msra.mxu1 %v697_v56 }
 0x3f8   :  { %v449_v58 = vpop.f32.mrf.mxu1 }
 0x3f9   :  { %v464_v59 = vmul.f32 %v459_v57, %v449_v58 }
 0x3fa   :  { %v661_v60 = vpop.f32.mrf.mxu1 }
 0x3fb   :  { %v466_v61 = vsel %vm322_vm3, %v464_v59, 0.0 }
 0x3fc   :  { %v467_v63 = vrot.slane %v466_v61, 4  ;;  %v452_v0 = vpop.f32.mrf.mxu1 }
 0x3fd   :  { %v465_v1 = vmul.f32 %v461_v62, %v452_v0 }
 0x3fe   :  { %v468_v2 = vadd.f32 %v467_v63, %v466_v61  ;;  %v662_v3 = vpop.f32.mrf.mxu1 }
 0x3ff   :  { %v473_v4 = vsel %vm322_vm3, %v465_v1, 0.0 }
 0x400   :  { %v469_v16 = vrot.slane %v468_v2, 2  ;;  %v474_v5 = vrot.slane %v473_v4, 4 }
 0x402   :  { %v470_v6 = vadd.f32 %v469_v16, %v468_v2  ;;  %v475_v7 = vadd.f32 %v474_v5, %v473_v4 }
 0x404   :  { %v471_v8 = vrot.slane %v470_v6, 1  ;;  %v476_v9 = vrot.slane %v475_v7, 2 }
 0x406   :  { %v472_v10 = vadd.f32 %v471_v8, %v470_v6  ;;  %v477_v11 = vadd.f32 %v476_v9, %v475_v7 }
 0x408   :  { %v478_v12 = vrot.slane %v477_v11, 1  ;;  %v480_v13 = vpack.c.bf16 %v472_v10, %v472_v10 }
 0x40a   :  { %v479_v14 = vadd.f32 %v478_v12, %v477_v11  ;;  %v499_v17 = vunpack.c.l.b16 %v480_v13 }
 0x40c   :  { %v481_v15 = vpack.c.bf16 %v479_v14, %v479_v14 }
 0x40e   :  { %v500_v18 = vunpack.c.l.b16 %v481_v15 }
 0x410   :  { %v501_v19 = vsel %vm196_vm2, %v500_v18, %v499_v17 }
 0x411   :  { %v502_v20 = vpack.c.b16 %v501_v19, %v501_v19 }
 0x413   :  { %672 = vmatmul.mubr.msk.bf16.vlgmr.msra.gmra.mxu1 %vm322_vm3, %v502_v20 }
 0x4d3   :  { %v564_v22 = vpop.f32.mrf.mxu1 }
 0x4d4   :  { %v565_v23 = vadd.f32 %v603_v21, %v564_v22 }
 0x4d5   :  { %v673_v24 = vpop.f32.mrf.mxu1 }
 0x4d6   :  { %570 = vst [vmem:[#allocation8] sm:$0x3] %v565_v23 }
 0x4d7   :  { %v567_v25 = vpop.f32.mrf.mxu1 }
 0x4d8   :  { %781 = shalt.err (!%p778_p5)
}
 0x4d9   :  { %580 = dma.vmem_to_hbm [thread:$0]  %s578_s24, 32, %s960_s9, [#allocation4]   ;;  %v674_v26 = vpop.f32.mrf.mxu1 }
 0x4da   :  { %794 = dma.done.wait [#allocation4], 32  }
 0x4db   :  { %795 = vsyncadd [#allocation4], 4294967264 }
 0x4dc   :  { %584 = vsyncpa [#allocation3], 1 }
 0x4dd   :  { %585 = vsyncpa [#allocation6], 1 }
 0x4de   :  { %586 = vsyncpa [#allocation4], 1 }

</bundles_post_ra>
